<compile_context>
chip_gen: v6e
topology: v6e:2x2x1
jax: 0.10.0
libtpu: 0.0.40
codegen_flags: <defaults>
</compile_context>

<pallas_src>
import jax
import jax.numpy as jnp
from jax.experimental import pallas as pl
from jax.experimental.pallas import tpu as pltpu

NEG_SLOPE = 0.01   # F.leaky_relu default negative_slope
TB_CAP = 8192      # 1 MiB f32 x-tile; ~10-20x the per-step fixed overhead
MIN_STEPS = 8      # keep >= ~8 grid steps when possible (v7x has 2 TCs)


def _round_up(a, m):
    return ((a + m - 1) // m) * m


def _mlp_kernel(x_ref, w1t_ref, b1_ref, w2_ref, b2_ref, o_ref):
    # Batch lives on the lane axis throughout -> lane-dense output.
    # Layer 1: (Hp, in) @ (TB, in)^T -> (Hp, TB), bf16 MXU, f32 accumulate.
    x = x_ref[...].astype(jnp.bfloat16)            # cheap VPU cast, x stays f32 in HBM
    h = jax.lax.dot_general(
        w1t_ref[...], x,
        dimension_numbers=(((1,), (1,)), ((), ())),
        preferred_element_type=jnp.float32)
    h = h + b1_ref[...]                            # (Hp, 1) broadcast over lanes
    h = jnp.where(h > 0, h, NEG_SLOPE * h)         # leaky_relu on the VPU
    # Layer 2: (8, Hp) @ (Hp, TB) -> (8, TB); rows 1..7 of w2 are zero padding.
    y = jnp.dot(w2_ref[...], h.astype(jnp.bfloat16),
                preferred_element_type=jnp.float32)
    y = y[0:1, :] + b2_ref[0, 0]                   # (1, TB), lane-dense over batch
    o_ref[...] = y[None].astype(o_ref.dtype)       # (1, 1, TB) block


def binary_classifier_one_layer(x, w1, b1, w2, b2):
    """x: [B, in] f32; w1: [in, hidden]; b1: [hidden]; w2: [hidden, 1]; b2: [1]
    -> [B, 1] f32."""
    B, in_size = x.shape
    H = w1.shape[1]
    Hp = _round_up(H, 128)                         # full 128-lane hidden dim

    TB = min(TB_CAP, max(8, _round_up(pl.cdiv(B, MIN_STEPS), 8)))
    G = pl.cdiv(B, TB)                             # ragged tail handled by Pallas

    # One-time tiny weight prep (x itself is untouched in HBM).
    w1t = jnp.pad(w1, ((0, 0), (0, Hp - H))).T.astype(jnp.bfloat16)   # (Hp, in)
    b1c = jnp.pad(b1, (0, Hp - H)).reshape(Hp, 1).astype(jnp.float32)  # (Hp, 1)
    w2p = jnp.pad(w2.reshape(1, -1).astype(jnp.float32),
                  ((0, 7), (0, Hp - H))).astype(jnp.bfloat16)          # (8, Hp)
    b2s = b2.reshape(1, 1).astype(jnp.float32)                         # (1, 1) SMEM

    flops = 2 * G * TB * Hp * (in_size + 8) + 3 * G * TB * Hp
    bytes_accessed = 4 * G * TB * in_size + 2 * in_size * Hp + 4 * Hp \
        + 2 * 8 * Hp + 4 + 4 * G * TB

    out = pl.pallas_call(
        _mlp_kernel,
        out_shape=jax.ShapeDtypeStruct((G, 1, TB), x.dtype),
        grid_spec=pl.GridSpec(
            grid=(G,),
            in_specs=[
                # x tiled along batch; boundary block padding only feeds
                # output lanes that are discarded below.
                pl.BlockSpec((TB, in_size), lambda i: (i, 0)),
                # Weights / biases resident in VMEM across all grid steps.
                pl.BlockSpec((Hp, in_size), lambda i: (0, 0)),
                pl.BlockSpec((Hp, 1), lambda i: (0, 0)),
                pl.BlockSpec((8, Hp), lambda i: (0, 0)),
                # Scalar bias in SMEM.
                pl.BlockSpec(memory_space=pltpu.MemorySpace.SMEM),
            ],
            out_specs=pl.BlockSpec((1, 1, TB), lambda i: (i, 0, 0)),
        ),
        compiler_params=pltpu.CompilerParams(
            dimension_semantics=("parallel",),     # shard batch tiles over TCs
            vmem_limit_bytes=32 * 1024 * 1024,
        ),
        cost_estimate=pl.CostEstimate(
            flops=flops, transcendentals=0, bytes_accessed=bytes_accessed),
    )(x, w1t, b1c, w2p, b2s)

    # (G, 1, TB) -> (G*TB, 1); drop padded tail rows.
    return out.reshape(G * TB, 1)[:B]


def init_params(key, input_size, hidden_size_1=100, dtype=jnp.float32):
    """Deterministic init mimicking torch.nn.Linear (U(-1/sqrt(fan_in), +))."""
    k1, k2, k3, k4 = jax.random.split(key, 4)
    bound1 = 1.0 / jnp.sqrt(jnp.asarray(input_size, dtype))
    bound2 = 1.0 / jnp.sqrt(jnp.asarray(hidden_size_1, dtype))
    # Stored transposed relative to torch (torch weight is [out, in]):
    # w1: [in, hidden], w2: [hidden, 1] so the math is x @ w.
    w1 = jax.random.uniform(k1, (input_size, hidden_size_1), dtype, -bound1, bound1)
    b1 = jax.random.uniform(k2, (hidden_size_1,), dtype, -bound1, bound1)
    w2 = jax.random.uniform(k3, (hidden_size_1, 1), dtype, -bound2, bound2)
    b2 = jax.random.uniform(k4, (1,), dtype, -bound2, bound2)
    return w1, b1, w2, b2


def _reference(x, w1, b1, w2, b2):
    h = x @ w1 + b1
    h = jnp.where(h > 0, h, NEG_SLOPE * h)
    return h @ w2 + b2


if __name__ == "__main__":
    key = jax.random.PRNGKey(0)
    kx, kp, kx2 = jax.random.split(key, 3)

    input_size, hidden = 32, 100
    w1, b1, w2, b2 = init_params(kp, input_size, hidden)

    # Small, tile-aligned batch.
    batch = 8
    x = jax.random.normal(kx, (batch, input_size), jnp.float32)
    out = jax.block_until_ready(binary_classifier_one_layer(x, w1, b1, w2, b2))
    ref = _reference(x, w1, b1, w2, b2)
    assert out.shape == (batch, 1), out.shape
    # bf16 MXU inputs (f32 accumulation) -> compare against f32 ref with a
    # tolerance consistent with bf16 rounding of the operands.
    assert jnp.allclose(out, ref, atol=3e-2, rtol=3e-2), "mismatch vs reference"

    # Ragged batch exercises the Pallas boundary-block (no wrapper pad) path.
    batch2 = 13
    x2 = jax.random.normal(kx2, (batch2, input_size), jnp.float32)
    out2 = jax.block_until_ready(binary_classifier_one_layer(x2, w1, b1, w2, b2))
    ref2 = _reference(x2, w1, b1, w2, b2)
    assert out2.shape == (batch2, 1), out2.shape
    assert jnp.allclose(out2, ref2, atol=3e-2, rtol=3e-2), "mismatch vs reference (ragged)"

    print("KERNEL_OK")
</pallas_src>

<mosaic_0001>
module attributes {stable_mosaic.version = 11 : i64} {
  func.func @_mlp_kernel(%arg0: i32, %arg1: memref<8x32xf32, #tpu.memory_space<vmem>>, %arg2: memref<128x32xbf16, #tpu.memory_space<vmem>>, %arg3: memref<128x1xf32, #tpu.memory_space<vmem>>, %arg4: memref<8x128xbf16, #tpu.memory_space<vmem>>, %arg5: memref<1x1xf32, #tpu.memory_space<smem>>, %arg6: memref<1x1x8xf32, #tpu.memory_space<vmem>>) attributes {dimension_semantics = [#tpu.dimension_semantics<parallel>], iteration_bounds = array<i64: 1>, scalar_prefetch = 0 : i64, scratch_operands = 0 : i64, tpu.core_type = #tpu.core_type<tc>, window_params = [{transform_indices = @transform_0, window_bounds = array<i64: 8, 32>}, {pipeline_mode = #tpu.pipeline_mode<synchronous>, transform_indices = @transform_1, window_bounds = array<i64: 128, 32>}, {pipeline_mode = #tpu.pipeline_mode<synchronous>, transform_indices = @transform_2, window_bounds = array<i64: 128, 1>}, {pipeline_mode = #tpu.pipeline_mode<synchronous>, transform_indices = @transform_3, window_bounds = array<i64: 8, 128>}, {transform_indices = @transform_4, window_bounds = array<i64: 1, 1>}, {transform_indices = @transform_5, window_bounds = array<i64: 1, 1, 8>}]} {
    %c0 = arith.constant 0 : index
    %c0_0 = arith.constant 0 : index
    %0 = vector.load %arg1[%c0, %c0_0] : memref<8x32xf32, #tpu.memory_space<vmem>>, vector<8x32xf32>
    %1 = arith.truncf %0 : vector<8x32xf32> to vector<8x32xbf16>
    %c0_1 = arith.constant 0 : index
    %c0_2 = arith.constant 0 : index
    %2 = vector.load %arg2[%c0_1, %c0_2] : memref<128x32xbf16, #tpu.memory_space<vmem>>, vector<128x32xbf16>
    %cst = arith.constant dense<0.000000e+00> : vector<128x8xf32>
    %3 = tpu.matmul %2, %1, %cst {dimension_numbers = #tpu.dot_dimension_numbers<[1], [1], [0], [0], [0, 0, 1, 0], [], []>} : vector<128x32xbf16>, vector<8x32xbf16>, vector<128x8xf32> -> vector<128x8xf32>
    %c0_3 = arith.constant 0 : index
    %c0_4 = arith.constant 0 : index
    %4 = vector.load %arg3[%c0_3, %c0_4] : memref<128x1xf32, #tpu.memory_space<vmem>>, vector<128x1xf32>
    %5 = vector.broadcast %4 : vector<128x1xf32> to vector<128x8xf32>
    %6 = arith.addf %3, %5 : vector<128x8xf32>
    %cst_5 = arith.constant 0.000000e+00 : f32
    %7 = vector.broadcast %cst_5 : f32 to vector<128x8xf32>
    %8 = arith.cmpf ogt, %6, %7 : vector<128x8xf32>
    %cst_6 = arith.constant 0.00999999977 : f32
    %9 = vector.broadcast %cst_6 : f32 to vector<128x8xf32>
    %10 = arith.mulf %9, %6 : vector<128x8xf32>
    %11 = arith.select %8, %6, %10 : vector<128x8xi1>, vector<128x8xf32>
    %c0_7 = arith.constant 0 : index
    %c0_8 = arith.constant 0 : index
    %12 = vector.load %arg4[%c0_7, %c0_8] : memref<8x128xbf16, #tpu.memory_space<vmem>>, vector<8x128xbf16>
    %13 = arith.truncf %11 : vector<128x8xf32> to vector<128x8xbf16>
    %cst_9 = arith.constant dense<0.000000e+00> : vector<8x8xf32>
    %14 = tpu.matmul %12, %13, %cst_9 {dimension_numbers = #tpu.dot_dimension_numbers<[1], [0], [0], [1], [0, 0, 1, 1], [], []>} : vector<8x128xbf16>, vector<128x8xbf16>, vector<8x8xf32> -> vector<8x8xf32>
    %15 = vector.extract_strided_slice %14 {offsets = [0, 0], sizes = [1, 8], strides = [1, 1]} : vector<8x8xf32> to vector<1x8xf32>
    %c0_10 = arith.constant 0 : index
    %c0_11 = arith.constant 0 : index
    %16 = memref.load %arg5[%c0_10, %c0_11] : memref<1x1xf32, #tpu.memory_space<smem>>
    %17 = vector.broadcast %16 : f32 to vector<1x8xf32>
    %18 = arith.addf %15, %17 : vector<1x8xf32>
    %19 = vector.shape_cast %18 : vector<1x8xf32> to vector<1x1x8xf32>
    %c0_12 = arith.constant 0 : index
    %c0_13 = arith.constant 0 : index
    %c0_14 = arith.constant 0 : index
    %20 = vector.load %arg6[%c0_12, %c0_13, %c0_14] : memref<1x1x8xf32, #tpu.memory_space<vmem>>, vector<1x1x8xf32>
    tpu.vector_store %arg6[%c0_12, %c0_13, %c0_14], %19 {strides = array<i32>} : memref<1x1x8xf32, #tpu.memory_space<vmem>>, vector<1x1x8xf32>,
    return
  }
  func.func @transform_0(%arg0: i32) -> (i32, i32) {
    %c0_i32 = arith.constant 0 : i32
    %c0_i32_0 = arith.constant 0 : i32
    return %arg0, %c0_i32 : i32, i32
  }
  func.func @transform_1(%arg0: i32) -> (i32, i32) {
    %c0_i32 = arith.constant 0 : i32
    %c0_i32_0 = arith.constant 0 : i32
    %c0_i32_1 = arith.constant 0 : i32
    return %c0_i32, %c0_i32_0 : i32, i32
  }
  func.func @transform_2(%arg0: i32) -> (i32, i32) {
    %c0_i32 = arith.constant 0 : i32
    %c0_i32_0 = arith.constant 0 : i32
    %c0_i32_1 = arith.constant 0 : i32
    return %c0_i32, %c0_i32_0 : i32, i32
  }
  func.func @transform_3(%arg0: i32) -> (i32, i32) {
    %c0_i32 = arith.constant 0 : i32
    %c0_i32_0 = arith.constant 0 : i32
    %c0_i32_1 = arith.constant 0 : i32
    return %c0_i32, %c0_i32_0 : i32, i32
  }
  func.func @transform_4(%arg0: i32) -> (i32, i32) {
    %c0_i32 = arith.constant 0 : i32
    %c0_i32_0 = arith.constant 0 : i32
    %c0_i32_1 = arith.constant 0 : i32
    return %c0_i32, %c0_i32_0 : i32, i32
  }
  func.func @transform_5(%arg0: i32) -> (i32, i32, i32) {
    %c0_i32 = arith.constant 0 : i32
    %c0_i32_0 = arith.constant 0 : i32
    %c0_i32_1 = arith.constant 0 : i32
    return %arg0, %c0_i32, %c0_i32_0 : i32, i32, i32
  }
}

</mosaic_0001>

<bundles_post_ra>
// kernel: tpu_custom_call.1
= control target key start
LH: loop header
LB: loop body
LE: loop exit
PB: predicated region body
PF: predicated region fallthrough
CT: control target
= control target key end

     0   :  { %vm177_vm0 = vcmask 261120   ;;  %v527_v3 = vmov 0   ;;  %s679_s0 = inlined_call_operand.vmem [shape: f32[8,32], index: 0, kind: input, shape index: {}]   ;;  %s680_s1 = inlined_call_operand.vmem [shape: bf16[128,32], index: 1, kind: input, shape index: {}]   ;;  %s681_s2 = inlined_call_operand.vmem [shape: f32[128,1], index: 2, kind: input, shape index: {}]   ;;  %s682_s3 = inlined_call_operand.vmem [shape: bf16[8,128], index: 3, kind: input, shape index: {}]   ;;  %s683_s4 = inlined_call_operand.<no memory space> [shape: f32[1,1], index: 4, kind: input, shape index: {}]   ;;  %s684_s5 = inlined_call_operand.hbm [shape: f32[1,1,8], index: 5, kind: output, shape index: {}]  }
   0x1   :  { %v23_v0 = vld [vmem:[%s679_s0] sm:$0xff]  ;;  %495 = vset.pattern.permute.xlu0 %v527_v3  ;;  %496 = vset.pattern.permute.xlu1 %v527_v3  ;;  %v498_v5 = vld [vmem:[%s680_s1 + $0x8] sm:$0xff]   ;;  %v499_v6 = vld [vmem:[%s680_s1 + $0x10] sm:$0xff]  }
   0x2   :  { %v24_v1 = vpack.c.bf16 %v23_v0, %v23_v0  ;;  %v497_v2 = vld [vmem:[%s680_s1] sm:$0xff]   ;;  %v55_v7 = vld [vmem:[%s681_s2 + $0x70] sm:$0xff]  ;;  %v56_v9 = vld [vmem:[%s681_s2 + $0x78] sm:$0xff] }
   0x3   :  { %454 = vmatprep.mubr.msk.bf16.mxu0 %vm177_vm0, %v497_v2  ;;  %129 = vperm.xlu0 %495, %v55_v7   ;;  %v53_v8 = vld [vmem:[%s681_s2 + $0x60] sm:$0xff]  ;;  %v54_v10 = vld [vmem:[%s681_s2 + $0x68] sm:$0xff] }
   0x4   :  { %490 = vmatprep.subr.msk.bf16.mxu0 %vm177_vm0, %v24_v1  ;;  %v203_v4 = vsel %vm177_vm0, %v24_v1, 0  ;;  %119 = vperm.xlu1 %496, %v53_v8  }
   0x5   :  { %453 = vmatpush3.bf16.xpose.msra.mxu0 %v203_v4 }
   0x7   :  { %134 = vperm.xlu0 %495, %v56_v9  }
   0xc   :  { %455 = vmatmul.mubr.msk.bf16.vlgmr.msra.gmra.mxu0 %vm177_vm0, %v498_v5 }
   0xd   :  { %458 = vmatprep.mubr.msk.bf16.mxu0 %vm177_vm0, %v499_v6 }
   0xe   :  { %11 = vsyncpa [#allocation4], 0  ;;  %124 = vperm.xlu1 %496, %v54_v10   ;;  %v51_v11 = vld [vmem:[%s681_s2 + $0x50] sm:$0xff]  ;;  %v500_v12 = vld [vmem:[%s680_s1 + $0x18] sm:$0xff]   ;;  %v528_v28 = vmov 0.0   ;;  %vm529_vm1 = vmmov 0  }
   0xf   :  { %v52_v13 = vld [vmem:[%s681_s2 + $0x58] sm:$0xff]  ;;  %v501_v14 = vld [vmem:[%s680_s1 + $0x20] sm:$0xff]   ;;  %109 = vperm.xlu0 %495, %v51_v11   ;;  %v50_v16 = vld [vmem:[%s681_s2 + $0x48] sm:$0xff]  ;;  %470 = vmatprep.subr.bf16.mxu1 %v528_v28  ;;  %s530_s18 = smov [#allocation3]  }
  0x10   :  { %v49_v15 = vld [vmem:[%s681_s2 + $0x40] sm:$0xff]  ;;  %v47_v17 = vld [vmem:[%s681_s2 + $0x30] sm:$0xff]  ;;  %v502_v18 = vld [vmem:[%s680_s1 + $0x28] sm:$0xff]   ;;  %486 = vmatprep.mubr.msk.bf16.mxu1 %vm529_vm1, %v528_v28  ;;  %s410_s19 = sshll.u32 %s530_s18, 4  ;;  %s411_s19 = int_to_ptr.vmem [resolvable:$true] %s410_s19 }
  0x11   :  { %v48_v19 = vld [vmem:[%s681_s2 + $0x38] sm:$0xff]  ;;  %v503_v20 = vld [vmem:[%s680_s1 + $0x30] sm:$0xff]   ;;  %v45_v21 = vld [vmem:[%s681_s2 + $0x20] sm:$0xff]  ;;  %s505_s20 = scalar_lea.vmem %s411_s19, 16  ;;  %s509_s21 = scalar_lea.vmem %s411_s19, 32 }
  0x12   :  { %114 = vperm.xlu1 %496, %v52_v13   ;;  %v46_v22 = vld [vmem:[%s681_s2 + $0x28] sm:$0xff]  ;;  %v43_v23 = vld [vmem:[%s681_s2 + $0x10] sm:$0xff]  ;;  %v504_v24 = vld [vmem:[%s680_s1 + $0x38] sm:$0xff]   ;;  %p506_p0 = scmp.ne.s32.totalorder %s411_s19, %s505_s20  ;;  %p510_p1 = scmp.lt.s32.totalorder %s411_s19, %s411_s19 }
  0x13   :  { %99 = vperm.xlu0 %495, %v49_v15   ;;  %v44_v25 = vld [vmem:[%s681_s2 + $0x18] sm:$0xff]  ;;  %v41_v26 = vld [vmem:[%s681_s2] sm:$0xff]  ;;  %v42_v27 = vld [vmem:[%s681_s2 + $0x8] sm:$0xff]  ;;  %p511_p2 = scmp.lt.s32.totalorder %s509_s21, %s505_s20 }
  0x14   :  { %459 = vmatmul.mubr.msk.bf16.gmra.mxu0 %vm177_vm0, %v500_v12 }
  0x15   :  { %462 = vmatprep.mubr.msk.bf16.mxu0 %vm177_vm0, %v501_v14  ;;  %p512_p3 = por %p511_p2, %p510_p1 }
  0x16   :  { %104 = vperm.xlu1 %496, %v50_v16  }
  0x17   :  { %89 = vperm.xlu0 %495, %v47_v17   ;;  %p513_p4 = pnand %p512_p3, %p506_p0 }
  0x1a   :  { %94 = vperm.xlu1 %496, %v48_v19  }
  0x1b   :  { %79 = vperm.xlu0 %495, %v45_v21  }
  0x1c   :  { %463 = vmatmul.mubr.msk.bf16.gmra.mxu0 %vm177_vm0, %v502_v18 }
  0x1d   :  { %466 = vmatprep.mubr.msk.bf16.mxu0 %vm177_vm0, %v503_v20 }
  0x1e   :  { %84 = vperm.xlu1 %496, %v46_v22  }
  0x1f   :  { %69 = vperm.xlu0 %495, %v43_v23  }
  0x22   :  { %74 = vperm.xlu1 %496, %v44_v25  }
  0x23   :  { %59 = vperm.xlu0 %495, %v41_v26  }
  0x24   :  { %467 = vmatmul.mubr.msk.bf16.gmra.mxu0 %vm177_vm0, %v504_v24 }
  0x26   :  { %64 = vperm.xlu1 %496, %v42_v27  }
  0x7e   :  { %v130_v34 = vpop.permute.xlu0 %129 }
  0x7f   :  { %v120_v32 = vpop.permute.xlu1 %119 }
  0x82   :  { %v135_v39 = vpop.permute.xlu0 %134 }
  0x89   :  { %v125_v37 = vpop.permute.xlu1 %124 }
  0x8a   :  { %v110_v44 = vpop.permute.xlu0 %109 }
  0x8d   :  { %v115_v42 = vpop.permute.xlu1 %114 }
  0x8e   :  { %v100_v50 = vpop.permute.xlu0 %99 }
  0x91   :  { %v105_v47 = vpop.permute.xlu1 %104 }
  0x92   :  { %v90_v61 = vpop.permute.xlu0 %89 }
  0x95   :  { %v95_v56 = vpop.permute.xlu1 %94 }
  0x96   :  { %v80_v11 = vpop.permute.xlu0 %79 }
  0x99   :  { %v85_v7 = vpop.permute.xlu1 %84 }
  0x9a   :  { %v70_v24 = vpop.permute.xlu0 %69 }
  0x9d   :  { %v75_v19 = vpop.permute.xlu1 %74 }
  0xcc   :  { %v648_v29 = vpop.f32.mrf.mxu0 }
  0xce   :  { %v650_v30 = vpop.f32.mrf.mxu0 }
  0xd0   :  { %v652_v31 = vpop.f32.mrf.mxu0 }
  0xd2   :  { %v654_v33 = vpop.f32.mrf.mxu0 }
  0xd4   :  { %v460_v35 = vpop.f32.mrf.mxu0 }
  0xd5   :  { %v264_v16 = vadd.f32 %v460_v35, %v90_v61 }
  0xd6   :  { %v656_v36 = vpop.f32.mrf.mxu0 }
  0xd7   :  { %v324_v25 = vmul.f32 0.01, %v264_v16  ;;  %v256_v26 = vadd.f32 %v656_v36, %v80_v11  ;;  %vm308_vm11 = vcmp.gt.f32.partialorder %v264_v16, 0.0 }
  0xd8   :  { %v461_v38 = vpop.f32.mrf.mxu0 }
  0xd9   :  { %v267_v13 = vadd.f32 %v461_v38, %v95_v56  ;;  %v65_v38 = vpop.permute.xlu1 %64  ;;  %vm306_vm13 = vcmp.gt.f32.partialorder %v256_v26, 0.0 }
  0xda   :  { %v258_v40 = vpop.f32.mrf.mxu0 }
  0xdb   :  { %v325_v21 = vmul.f32 0.01, %v267_v13  ;;  %v259_v22 = vadd.f32 %v258_v40, %v85_v7  ;;  %vm309_vm10 = vcmp.gt.f32.partialorder %v267_v13, 0.0  ;;  %v322_v40 = vmul.f32 0.01, %v256_v26 }
  0xdc   :  { %v464_v41 = vpop.f32.mrf.mxu0 }
  0xdd   :  { %v280_v62 = vadd.f32 %v464_v41, %v110_v44  ;;  %v323_v35 = vmul.f32 0.01, %v259_v22  ;;  %vm307_vm12 = vcmp.gt.f32.partialorder %v259_v22, 0.0  ;;  %v340_v41 = vsel %vm308_vm11, %v264_v16, %v324_v25 }
  0xde   :  { %v271_v43 = vpop.f32.mrf.mxu0  ;;  %v243_v44 = vadd.f32 %v654_v33, %v65_v38 }
  0xdf   :  { %v328_v8 = vmul.f32 0.01, %v280_v62  ;;  %v272_v9 = vadd.f32 %v271_v43, %v100_v50  ;;  %vm312_vm7 = vcmp.gt.f32.partialorder %v280_v62, 0.0 }
  0xe0   :  { %v465_v45 = vpop.f32.mrf.mxu0  ;;  %vm303_vm0 = vcmp.gt.f32.partialorder %v243_v44, 0.0 }
  0xe1   :  { %v283_v58 = vadd.f32 %v465_v45, %v115_v42  ;;  %v326_v17 = vmul.f32 0.01, %v272_v9  ;;  %v344_v18 = vsel %vm312_vm7, %v280_v62, %v328_v8  ;;  %vm310_vm9 = vcmp.gt.f32.partialorder %v272_v9, 0.0  ;;  %v60_v42 = vpop.permute.xlu0 %59 }
  0xe2   :  { %v274_v46 = vpop.f32.mrf.mxu0  ;;  %v339_v45 = vsel %vm307_vm12, %v259_v22, %v323_v35 }
  0xe3   :  { %v329_v4 = vmul.f32 0.01, %v283_v58  ;;  %v275_v5 = vadd.f32 %v274_v46, %v105_v47  ;;  %vm313_vm6 = vcmp.gt.f32.partialorder %v283_v58, 0.0  ;;  %v342_v27 = vsel %vm310_vm9, %v272_v9, %v326_v17 }
  0xe4   :  { %v468_v48 = vpop.f32.mrf.mxu0  ;;  %v240_v46 = vadd.f32 %v650_v30, %v60_v42  ;;  %v338_v47 = vsel %vm306_vm13, %v256_v26, %v322_v40 }
  0xe5   :  { %v296_v49 = vadd.f32 %v468_v48, %v130_v34  ;;  %v327_v14 = vmul.f32 0.01, %v275_v5  ;;  %v345_v15 = vsel %vm313_vm6, %v283_v58, %v329_v4  ;;  %vm311_vm8 = vcmp.gt.f32.partialorder %v275_v5, 0.0 }
  0xe6   :  { %v287_v51 = vpop.f32.mrf.mxu0  ;;  %v356_v20 = vpack.c.bf16 %v345_v15, %v344_v18  ;;  %v251_v34 = vadd.f32 %v652_v31, %v75_v19  ;;  %v319_v48 = vmul.f32 0.01, %v243_v44  ;;  %v318_v50 = vmul.f32 0.01, %v240_v46 }
  0xe7   :  { %v288_v52 = vadd.f32 %v287_v51, %v120_v32  ;;  %v332_v54 = vmul.f32 0.01, %v296_v49  ;;  %vm316_vm2 = vcmp.gt.f32.partialorder %v296_v49, 0.0  ;;  %v343_v23 = vsel %vm311_vm8, %v275_v5, %v327_v14 }
  0xe8   :  { %v469_v53 = vpop.f32.mrf.mxu0  ;;  %v355_v32 = vpack.c.bf16 %v343_v23, %v342_v27  ;;  %v321_v43 = vmul.f32 0.01, %v251_v34  ;;  %vm305_vm14 = vcmp.gt.f32.partialorder %v251_v34, 0.0  ;;  %vm302_vm1 = vcmp.gt.f32.partialorder %v240_v46, 0.0 }
  0xe9   :  { %v299_v55 = vadd.f32 %v469_v53, %v135_v39  ;;  %v330_v63 = vmul.f32 0.01, %v288_v52  ;;  %v348_v1 = vsel %vm316_vm2, %v296_v49, %v332_v54  ;;  %vm314_vm5 = vcmp.gt.f32.partialorder %v288_v52, 0.0  ;;  %v350_v54 = vld [vmem:[%s682_s3] sm:$0xf] }
  0xea   :  { %v290_v57 = vpop.f32.mrf.mxu0  ;;  %v248_v39 = vadd.f32 %v648_v29, %v70_v24  ;;  %v353_v29 = vpack.c.bf16 %v339_v45, %v338_v47  ;;  %v337_v49 = vsel %vm305_vm14, %v251_v34, %v321_v43  ;;  %v334_v30 = vsel %vm302_vm1, %v240_v46, %v318_v50 }
  0xeb   :  { %v333_v59 = vmul.f32 0.01, %v299_v55  ;;  %v291_v60 = vadd.f32 %v290_v57, %v125_v37  ;;  %vm317_vm3 = vcmp.gt.f32.partialorder %v299_v55, 0.0  ;;  %v346_v10 = vsel %vm314_vm5, %v288_v52, %v330_v63 }
  0xec   :  { %v341_v37 = vsel %vm309_vm10, %v267_v13, %v325_v21  ;;  %v320_v31 = vmul.f32 0.01, %v248_v39  ;;  %vm304_vm15 = vcmp.gt.f32.partialorder %v248_v39, 0.0  ;;  %v335_v52 = vsel %vm303_vm0, %v243_v44, %v319_v48 }
  0xed   :  { %vm315_vm4 = vcmp.gt.f32.partialorder %v291_v60, 0.0  ;;  %v331_v0 = vmul.f32 0.01, %v291_v60  ;;  %v349_v2 = vsel %vm317_vm3, %v299_v55, %v333_v59  ;;  %v354_v36 = vpack.c.bf16 %v341_v37, %v340_v41 }
  0xee   :  { %v358_v3 = vpack.c.bf16 %v349_v2, %v348_v1  ;;  %v336_v51 = vsel %vm304_vm15, %v248_v39, %v320_v31  ;;  %v351_v53 = vpack.c.bf16 %v335_v52, %v334_v30  ;;  %v400_v55 = vstv %s683_s4 }
  0xef   :  { %v347_v6 = vsel %vm315_vm4, %v291_v60, %v331_v0  ;;  %v352_v33 = vpack.c.bf16 %v337_v49, %v336_v51  ;;  %vm402_vm2 = vcmask 57344  }
  0xf0   :  { %471 = vmatpush3.bf16.msra.mxu1 %v358_v3  ;;  %v357_v12 = vpack.c.bf16 %v347_v6, %v346_v10 }
  0xf1   :  { %472 = vmatprep.subr.bf16.mxu1 %v528_v28 }
  0xf4   :  { %473 = vmatpush3.bf16.msra.mxu1 %v357_v12 }
  0xf5   :  { %474 = vmatprep.subr.bf16.mxu1 %v528_v28 }
  0xf8   :  { %475 = vmatpush3.bf16.msra.mxu1 %v356_v20 }
  0xf9   :  { %476 = vmatprep.subr.bf16.mxu1 %v528_v28 }
  0xfc   :  { %477 = vmatpush3.bf16.msra.mxu1 %v355_v32 }
  0xfd   :  { %478 = vmatprep.subr.bf16.mxu1 %v528_v28 }
 0x100   :  { %479 = vmatpush3.bf16.msra.mxu1 %v354_v36 }
 0x101   :  { %480 = vmatprep.subr.bf16.mxu1 %v528_v28 }
 0x104   :  { %481 = vmatpush3.bf16.msra.mxu1 %v353_v29 }
 0x105   :  { %482 = vmatprep.subr.bf16.mxu1 %v528_v28 }
 0x108   :  { %483 = vmatpush3.bf16.msra.mxu1 %v352_v33 }
 0x109   :  { %484 = vmatprep.subr.bf16.mxu1 %v528_v28 }
 0x10c   :  { %485 = vmatpush3.bf16.msra.mxu1 %v351_v53 }
 0x10f   :  { %487 = vmatmul.mubr.bf16.vlgmr.msra.gmra.mxu1 %v350_v54 }
 0x1cf   :  { %v393_v56 = vpop.f32.mrf.mxu1 }
 0x1d0   :  { %v401_v57 = vadd.f32 %v400_v55, %v393_v56 }
 0x1d1   :  { %v488_v58 = vpop.f32.mrf.mxu1 }
 0x1d2   :  { %403 = vst.msk [vmem:[#allocation3] sm:$0x1] %vm402_vm2, %v401_v57 }
 0x1d3   :  { %v396_v28 = vpop.f32.mrf.mxu1 }
 0x1d4   :  { %516 = shalt.err (!%p513_p4)
}
 0x1d5   :  { %413 = dma.vmem_to_hbm [thread:$0]  %s411_s19, 16, %s684_s5, [#allocation4]   ;;  %v489_v59 = vpop.f32.mrf.mxu1 }
 0x1d6   :  { %525 = dma.done.wait [#allocation4], 16  }
 0x1d7   :  { %526 = vsyncadd [#allocation4], 4294967280 }
 0x1d8   :  { %417 = vsyncpa [#allocation4], 1 }

</bundles_post_ra>
